<compile_context>
chip_gen: v6e
topology: v6e:2x2x1
jax: 0.10.0
libtpu: 0.0.40
codegen_flags: <defaults>
</compile_context>

<pallas_src>
import functools

import jax
import jax.numpy as jnp
from jax.experimental import pallas as pl
from jax.experimental.pallas import tpu as pltpu


# ---------------------------------------------------------------------------
# helpers
# ---------------------------------------------------------------------------
def _elu(x):
    # F.elu with alpha=1.0 ; expm1 for accuracy near zero
    return jnp.where(x > 0, x, jnp.expm1(x))


def _xavier_uniform(key, shape, dtype=jnp.float32):
    fan_in, fan_out = shape[0], shape[1]
    bound = (6.0 / (fan_in + fan_out)) ** 0.5
    return jax.random.uniform(key, shape, dtype, minval=-bound, maxval=bound)


def _full_spec(shape):
    return pl.BlockSpec(shape, lambda i: (0,) * len(shape))


def _offsets(widths):
    offs, acc = [], 0
    for w in widths:
        offs.append(acc)
        acc += w
    return tuple(offs), acc


# ---------------------------------------------------------------------------
# Pallas kernels
# ---------------------------------------------------------------------------
def upper_fused_kernel(a_ref, x_ref, w_ref, b_ref, o_ref, *, offsets):
    """Fused SparseNGCNLayer group.

    Per layer i (0-based): relu(X @ W_i + b_i), then i adjacency hops.
    Implemented as one wide matmul followed by lane-suffix hops: after pass k,
    every column at offset >= offsets[k] has received k hops.
    """
    total = o_ref.shape[1]
    base = jnp.dot(x_ref[...], w_ref[...], preferred_element_type=jnp.float32)
    o_ref[...] = jnp.maximum(base + b_ref[...], 0.0)
    a = a_ref[...]
    for start in offsets[1:]:
        width = total - start
        o_ref[:, pl.ds(start, width)] = jnp.dot(
            a, o_ref[:, pl.ds(start, width)], preferred_element_type=jnp.float32)


def bottom_head_kernel(a_ref, x_ref, w_ref, b_ref, oh_ref, wb_ref, bb_ref,
                       sel_ref, w1_ref, b1_ref, w2_ref, b2_ref,
                       latent_ref, pred_ref, *, offsets, hidden1):
    """Fused DenseNGCNLayer group + pair gather + bilinear head + decoder MLP.

    Dense layers: X @ W_i, i adjacency hops, + b_i (bias after hops).
    Gather: one-hot (2P, N) @ latent on the MXU.
    Bilinear: x1 @ W_flat -> (P, H*D), multiply by lane-replicated x2, reduce
    with a block-diagonal 0/1 (H*D, H) matrix on the MXU (no reshape / XLU sum).
    """
    total = latent_ref.shape[1]
    latent_ref[...] = jnp.dot(x_ref[...], w_ref[...],
                              preferred_element_type=jnp.float32)
    a = a_ref[...]
    for start in offsets[1:]:
        width = total - start
        latent_ref[:, pl.ds(start, width)] = jnp.dot(
            a, latent_ref[:, pl.ds(start, width)],
            preferred_element_type=jnp.float32)
    latent_ref[...] = latent_ref[...] + b_ref[...]
    latent = latent_ref[...]                                        # (N, D2)

    # pair gather via one-hot matmul
    pairs = jnp.dot(oh_ref[...], latent,
                    preferred_element_type=jnp.float32)             # (2P, D2)
    p = pairs.shape[0] // 2
    x1 = pairs[:p, :]
    x2 = pairs[p:, :]

    # bilinear: bil[p,h] = sum_ij x1[p,i] W[h,i,j] x2[p,j] + b[h]
    t = jnp.dot(x1, wb_ref[...], preferred_element_type=jnp.float32)  # (P, H*D)
    x2_rep = jnp.concatenate([x2] * hidden1, axis=1)                  # (P, H*D)
    bil = jnp.dot(t * x2_rep, sel_ref[...],
                  preferred_element_type=jnp.float32) + bb_ref[...]   # (P, H)
    feat = _elu(bil)
    h1 = _elu(jnp.dot(feat, w1_ref[...], preferred_element_type=jnp.float32)
              + b1_ref[...])
    pred_ref[...] = jnp.dot(h1, w2_ref[...], preferred_element_type=jnp.float32) \
        + b2_ref[...]


# ---------------------------------------------------------------------------
# wrappers
# ---------------------------------------------------------------------------
def ngcn_upper_fused(adj, x, w_cat, b_cat, *, widths):
    n = adj.shape[0]
    offsets, c = _offsets(widths)
    flops = 2 * n * x.shape[1] * c + sum(2 * n * n * (c - s) for s in offsets[1:])
    bytes_accessed = 4 * (adj.size + x.size + w_cat.size + b_cat.size + n * c)
    return pl.pallas_call(
        functools.partial(upper_fused_kernel, offsets=offsets),
        out_shape=jax.ShapeDtypeStruct((n, c), jnp.float32),
        grid=(1,),
        in_specs=[_full_spec(adj.shape), _full_spec(x.shape),
                  _full_spec(w_cat.shape), _full_spec(b_cat.shape)],
        out_specs=_full_spec((n, c)),
        compiler_params=pltpu.CompilerParams(
            dimension_semantics=("arbitrary",)),
        cost_estimate=pl.CostEstimate(flops=int(flops), transcendentals=0,
                                      bytes_accessed=int(bytes_accessed)),
    )(adj, x, w_cat, b_cat)


def ngcn_bottom_head_fused(adj, x, w_cat, b_cat, oh, wb, bb, sel,
                           w1, b1, w2, b2, *, widths, hidden1):
    n = adj.shape[0]
    offsets, d2 = _offsets(widths)
    p = oh.shape[0] // 2
    flops = (2 * n * x.shape[1] * d2
             + sum(2 * n * n * (d2 - s) for s in offsets[1:])
             + 2 * oh.shape[0] * n * d2
             + 2 * p * d2 * wb.shape[1]
             + 2 * p * wb.shape[1] * hidden1
             + 2 * p * hidden1 * w1.shape[1]
             + 2 * p * w1.shape[1])
    bytes_accessed = 4 * (adj.size + x.size + w_cat.size + b_cat.size + oh.size
                          + wb.size + bb.size + sel.size + w1.size + b1.size
                          + w2.size + b2.size + n * d2 + p)
    return pl.pallas_call(
        functools.partial(bottom_head_kernel, offsets=offsets, hidden1=hidden1),
        out_shape=(jax.ShapeDtypeStruct((n, d2), jnp.float32),
                   jax.ShapeDtypeStruct((p, 1), jnp.float32)),
        grid=(1,),
        in_specs=[_full_spec(adj.shape), _full_spec(x.shape),
                  _full_spec(w_cat.shape), _full_spec(b_cat.shape),
                  _full_spec(oh.shape), _full_spec(wb.shape),
                  _full_spec(bb.shape), _full_spec(sel.shape),
                  _full_spec(w1.shape), _full_spec(b1.shape),
                  _full_spec(w2.shape), _full_spec(b2.shape)],
        out_specs=(_full_spec((n, d2)), _full_spec((p, 1))),
        compiler_params=pltpu.CompilerParams(
            dimension_semantics=("arbitrary",),
            vmem_limit_bytes=48 * 1024 * 1024),
        cost_estimate=pl.CostEstimate(flops=int(flops),
                                      transcendentals=int(p * (hidden1 + w1.shape[1])),
                                      bytes_accessed=int(bytes_accessed)),
    )(adj, x, w_cat, b_cat, oh, wb, bb, sel, w1, b1, w2, b2)


# ---------------------------------------------------------------------------
# MixHopNetwork in JAX (eval mode; dropout = identity)
# ---------------------------------------------------------------------------
def init_params(key, feature_number, layers_1, layers_2, hidden1, hidden2):
    d1 = sum(layers_1)
    d2 = sum(layers_2)
    keys = iter(jax.random.split(key, 64))
    # fused upper / bottom weights: per-layer xavier init, concatenated along lanes
    up_w = jnp.concatenate(
        [_xavier_uniform(next(keys), (feature_number, c)) for c in layers_1], axis=1)
    up_b = jnp.concatenate(
        [_xavier_uniform(next(keys), (1, c)) for c in layers_1], axis=1)
    bot_w = jnp.concatenate(
        [_xavier_uniform(next(keys), (d1, c)) for c in layers_2], axis=1)
    bot_b = jnp.concatenate(
        [_xavier_uniform(next(keys), (1, c)) for c in layers_2], axis=1)

    # nn.Bilinear(d2, d2, hidden1): weight (hidden1, d2, d2), bias (hidden1,)
    bound = 1.0 / d2 ** 0.5
    wbil = jax.random.uniform(next(keys), (hidden1, d2, d2), jnp.float32,
                              minval=-bound, maxval=bound)
    # wb[i, h*d2 + j] = wbil[h, i, j]  (host-side, one-time flatten)
    wb = jnp.transpose(wbil, (1, 0, 2)).reshape(d2, hidden1 * d2)
    bb = jax.random.uniform(next(keys), (1, hidden1), jnp.float32,
                            minval=-bound, maxval=bound)
    # block-diagonal 0/1 reduction matrix: sel[h*d2 + j, h] = 1
    sel = jnp.repeat(jnp.eye(hidden1, dtype=jnp.float32), d2, axis=0)

    # decoder: Linear(hidden1, hidden2) -> ELU -> Linear(hidden2, 1)
    dec_w1 = _xavier_uniform(next(keys), (hidden1, hidden2))
    dec_b1 = jnp.zeros((1, hidden2), jnp.float32)
    dec_w2 = _xavier_uniform(next(keys), (hidden2, 1))
    dec_b2 = jnp.zeros((1, 1), jnp.float32)
    return dict(up_w=up_w, up_b=up_b, bot_w=bot_w, bot_b=bot_b,
                bilinear_w=wb, bilinear_b=bb, bilinear_sel=sel,
                dec_w1=dec_w1, dec_b1=dec_b1, dec_w2=dec_w2, dec_b2=dec_b2)


def mixhop_forward(params, adj, features, idx, *, layers_1, layers_2, hidden1):
    # embed: fused upper (sparse) layers, iterations = 1..order_1
    abstract_1 = ngcn_upper_fused(adj, features, params["up_w"], params["up_b"],
                                  widths=layers_1)                 # (N, sum(layers_1))
    n = adj.shape[0]
    # pair-selection one-hots derived purely from idx (no latent round trip);
    # the kernel turns them into an MXU gather.
    oh = jax.nn.one_hot(jnp.concatenate([idx[0], idx[1]], axis=0), n,
                        dtype=jnp.float32)                         # (2P, N)
    latent, predictions = ngcn_bottom_head_fused(
        adj, abstract_1, params["bot_w"], params["bot_b"], oh,
        params["bilinear_w"], params["bilinear_b"], params["bilinear_sel"],
        params["dec_w1"], params["dec_b1"], params["dec_w2"], params["dec_b2"],
        widths=layers_2, hidden1=hidden1)
    return predictions, latent


# ---------------------------------------------------------------------------
if __name__ == "__main__":
    N = 64              # number of graph nodes
    F = 32              # feature_number
    P = 16              # number of node pairs (idx has shape (2, P))
    layers_1 = [32, 32, 32, 32]
    layers_2 = [32, 32, 32, 32]
    hidden1, hidden2 = 64, 32

    root = jax.random.PRNGKey(0)
    k_adj, k_feat, k_idx, k_par = jax.random.split(root, 4)

    # dense, row-normalized adjacency (stand-in for the sparse dict spmm input)
    raw = jax.random.uniform(k_adj, (N, N), jnp.float32)
    mask = (raw > 0.7).astype(jnp.float32) + jnp.eye(N, dtype=jnp.float32)
    adj = mask / jnp.sum(mask, axis=1, keepdims=True)

    features = jax.random.normal(k_feat, (N, F), jnp.float32)
    idx = jax.random.randint(k_idx, (2, P), 0, N)

    params = init_params(k_par, F, layers_1, layers_2, hidden1, hidden2)

    preds, latent = mixhop_forward(params, adj, features, idx,
                                   layers_1=layers_1, layers_2=layers_2,
                                   hidden1=hidden1)
    jax.block_until_ready((preds, latent))

    assert preds.shape == (P, 1)
    assert latent.shape == (N, sum(layers_2))
    print("KERNEL_OK")
</pallas_src>

<mosaic_0001>
module attributes {stable_mosaic.version = 11 : i64} {
  func.func @upper_fused_kernel(%arg0: i32, %arg1: memref<64x64xf32, #tpu.memory_space<vmem>>, %arg2: memref<64x32xf32, #tpu.memory_space<vmem>>, %arg3: memref<32x128xf32, #tpu.memory_space<vmem>>, %arg4: memref<1x128xf32, #tpu.memory_space<vmem>>, %arg5: memref<64x128xf32, #tpu.memory_space<vmem>>) attributes {dimension_semantics = [#tpu.dimension_semantics<arbitrary>], iteration_bounds = array<i64: 1>, scalar_prefetch = 0 : i64, scratch_operands = 0 : i64, tpu.core_type = #tpu.core_type<tc>, window_params = [{pipeline_mode = #tpu.pipeline_mode<synchronous>, transform_indices = @transform_0, window_bounds = array<i64: 64, 64>}, {pipeline_mode = #tpu.pipeline_mode<synchronous>, transform_indices = @transform_1, window_bounds = array<i64: 64, 32>}, {pipeline_mode = #tpu.pipeline_mode<synchronous>, transform_indices = @transform_2, window_bounds = array<i64: 32, 128>}, {pipeline_mode = #tpu.pipeline_mode<synchronous>, transform_indices = @transform_3, window_bounds = array<i64: 1, 128>}, {pipeline_mode = #tpu.pipeline_mode<synchronous>, transform_indices = @transform_4, window_bounds = array<i64: 64, 128>}]} {
    %c0 = arith.constant 0 : index
    %c0_0 = arith.constant 0 : index
    %0 = vector.load %arg2[%c0, %c0_0] : memref<64x32xf32, #tpu.memory_space<vmem>>, vector<64x32xf32>
    %c0_1 = arith.constant 0 : index
    %c0_2 = arith.constant 0 : index
    %1 = vector.load %arg3[%c0_1, %c0_2] : memref<32x128xf32, #tpu.memory_space<vmem>>, vector<32x128xf32>
    %cst = arith.constant dense<0.000000e+00> : vector<64x128xf32>
    %2 = tpu.matmul %0, %1, %cst {dimension_numbers = #tpu.dot_dimension_numbers<[1], [0], [0], [1], [0, 0, 1, 1], [], []>} : vector<64x32xf32>, vector<32x128xf32>, vector<64x128xf32> -> vector<64x128xf32>
    %c0_3 = arith.constant 0 : index
    %c0_4 = arith.constant 0 : index
    %3 = vector.load %arg4[%c0_3, %c0_4] : memref<1x128xf32, #tpu.memory_space<vmem>>, vector<1x128xf32>
    %4 = vector.broadcast %3 : vector<1x128xf32> to vector<64x128xf32>
    %5 = arith.addf %2, %4 : vector<64x128xf32>
    %cst_5 = arith.constant 0.000000e+00 : f32
    %6 = vector.broadcast %cst_5 : f32 to vector<64x128xf32>
    %7 = arith.maximumf %5, %6 : vector<64x128xf32>
    %c0_6 = arith.constant 0 : index
    %c0_7 = arith.constant 0 : index
    %8 = vector.load %arg5[%c0_6, %c0_7] : memref<64x128xf32, #tpu.memory_space<vmem>>, vector<64x128xf32>
    tpu.vector_store %arg5[%c0_6, %c0_7], %7 {strides = array<i32>} : memref<64x128xf32, #tpu.memory_space<vmem>>, vector<64x128xf32>,
    %c0_8 = arith.constant 0 : index
    %c0_9 = arith.constant 0 : index
    %9 = vector.load %arg1[%c0_8, %c0_9] : memref<64x64xf32, #tpu.memory_space<vmem>>, vector<64x64xf32>
    %c0_10 = arith.constant 0 : index
    %c32 = arith.constant 32 : index
    %10 = vector.load %arg5[%c0_10, %c32] : memref<64x128xf32, #tpu.memory_space<vmem>>, vector<64x96xf32>
    %cst_11 = arith.constant dense<0.000000e+00> : vector<64x96xf32>
    %11 = tpu.matmul %9, %10, %cst_11 {dimension_numbers = #tpu.dot_dimension_numbers<[1], [0], [0], [1], [0, 0, 1, 1], [], []>} : vector<64x64xf32>, vector<64x96xf32>, vector<64x96xf32> -> vector<64x96xf32>
    %c0_12 = arith.constant 0 : index
    %c32_13 = arith.constant 32 : index
    %12 = vector.load %arg5[%c0_12, %c32_13] : memref<64x128xf32, #tpu.memory_space<vmem>>, vector<64x96xf32>
    tpu.vector_store %arg5[%c0_12, %c32_13], %11 {strides = array<i32>} : memref<64x128xf32, #tpu.memory_space<vmem>>, vector<64x96xf32>,
    %c0_14 = arith.constant 0 : index
    %c64 = arith.constant 64 : index
    %13 = vector.load %arg5[%c0_14, %c64] : memref<64x128xf32, #tpu.memory_space<vmem>>, vector<64x64xf32>
    %cst_15 = arith.constant dense<0.000000e+00> : vector<64x64xf32>
    %14 = tpu.matmul %9, %13, %cst_15 {dimension_numbers = #tpu.dot_dimension_numbers<[1], [0], [0], [1], [0, 0, 1, 1], [], []>} : vector<64x64xf32>, vector<64x64xf32>, vector<64x64xf32> -> vector<64x64xf32>
    %c0_16 = arith.constant 0 : index
    %c64_17 = arith.constant 64 : index
    %15 = vector.load %arg5[%c0_16, %c64_17] : memref<64x128xf32, #tpu.memory_space<vmem>>, vector<64x64xf32>
    tpu.vector_store %arg5[%c0_16, %c64_17], %14 {strides = array<i32>} : memref<64x128xf32, #tpu.memory_space<vmem>>, vector<64x64xf32>,
    %c0_18 = arith.constant 0 : index
    %c96 = arith.constant 96 : index
    %16 = vector.load %arg5[%c0_18, %c96] : memref<64x128xf32, #tpu.memory_space<vmem>>, vector<64x32xf32>
    %cst_19 = arith.constant dense<0.000000e+00> : vector<64x32xf32>
    %17 = tpu.matmul %9, %16, %cst_19 {dimension_numbers = #tpu.dot_dimension_numbers<[1], [0], [0], [1], [0, 0, 1, 1], [], []>} : vector<64x64xf32>, vector<64x32xf32>, vector<64x32xf32> -> vector<64x32xf32>
    %c0_20 = arith.constant 0 : index
    %c96_21 = arith.constant 96 : index
    %18 = vector.load %arg5[%c0_20, %c96_21] : memref<64x128xf32, #tpu.memory_space<vmem>>, vector<64x32xf32>
    tpu.vector_store %arg5[%c0_20, %c96_21], %17 {strides = array<i32>} : memref<64x128xf32, #tpu.memory_space<vmem>>, vector<64x32xf32>,
    return
  }
  func.func @transform_0(%arg0: i32) -> (i32, i32) {
    %c0_i32 = arith.constant 0 : i32
    %c0_i32_0 = arith.constant 0 : i32
    %c0_i32_1 = arith.constant 0 : i32
    return %c0_i32, %c0_i32_0 : i32, i32
  }
  func.func @transform_1(%arg0: i32) -> (i32, i32) {
    %c0_i32 = arith.constant 0 : i32
    %c0_i32_0 = arith.constant 0 : i32
    %c0_i32_1 = arith.constant 0 : i32
    return %c0_i32, %c0_i32_0 : i32, i32
  }
  func.func @transform_2(%arg0: i32) -> (i32, i32) {
    %c0_i32 = arith.constant 0 : i32
    %c0_i32_0 = arith.constant 0 : i32
    %c0_i32_1 = arith.constant 0 : i32
    return %c0_i32, %c0_i32_0 : i32, i32
  }
  func.func @transform_3(%arg0: i32) -> (i32, i32) {
    %c0_i32 = arith.constant 0 : i32
    %c0_i32_0 = arith.constant 0 : i32
    %c0_i32_1 = arith.constant 0 : i32
    return %c0_i32, %c0_i32_0 : i32, i32
  }
  func.func @transform_4(%arg0: i32) -> (i32, i32) {
    %c0_i32 = arith.constant 0 : i32
    %c0_i32_0 = arith.constant 0 : i32
    %c0_i32_1 = arith.constant 0 : i32
    return %c0_i32, %c0_i32_0 : i32, i32
  }
}

</mosaic_0001>

<bundles_post_ra>
// kernel: tpu_custom_call.1
= control target key start
LH: loop header
LB: loop body
LE: loop exit
PB: predicated region body
PF: predicated region fallthrough
CT: control target
= control target key end

     0   :  { %vm37_vm0 = vcmask 261120   ;;  %s1272_s0 = inlined_call_operand.vmem [shape: f32[64,64], index: 0, kind: input, shape index: {}]   ;;  %s1273_s1 = inlined_call_operand.vmem [shape: f32[64,32], index: 1, kind: input, shape index: {}]   ;;  %s1274_s2 = inlined_call_operand.vmem [shape: f32[32,128], index: 2, kind: input, shape index: {}]   ;;  %s1275_s3 = inlined_call_operand.vmem [shape: f32[1,128], index: 3, kind: input, shape index: {}]   ;;  %s1276_s4 = inlined_call_operand.hbm [shape: f32[64,128], index: 4, kind: output, shape index: {}]  }
   0x1   :  { %v29_v0 = vld [vmem:[%s1274_s2 + $0x18] sm:$0xff]  ;;  %v28_v1 = vld [vmem:[%s1274_s2 + $0x10] sm:$0xff]  ;;  %v18_v2 = vld [vmem:[%s1273_s1] sm:$0xff] }
   0x2   :  { %883 = vmatprep.subr.mxu0 %v29_v0  ;;  %v27_v3 = vld [vmem:[%s1274_s2 + $0x8] sm:$0xff]  ;;  %891 = vmatprep.mubr.msk.f32.mxu0 %vm37_vm0, %v18_v2  ;;  %v26_v4 = vld [vmem:[%s1274_s2] sm:$0xff] }
   0x3   :  { %884 = vmatpush3.msra.mxu0 %v29_v0 }
   0x4   :  { %885 = vmatprep.subr.mxu0 %v28_v1 }
   0x5   :  { %886 = vmatpush3.msra.mxu0 %v28_v1 }
   0x6   :  { %9 = vsyncpa [#allocation3], 0  ;;  %887 = vmatprep.subr.mxu0 %v27_v3  ;;  %v19_v5 = vld [vmem:[%s1273_s1 + $0x8] sm:$0xff]  ;;  %v20_v6 = vld [vmem:[%s1273_s1 + $0x10] sm:$0xff]  ;;  %vm231_vm1 = vcmask 523264   ;;  %s1032_s29 = smov 32  }
   0x7   :  { %888 = vmatpush3.msra.mxu0 %v27_v3  ;;  %v21_v7 = vld [vmem:[%s1273_s1 + $0x18] sm:$0xff]  ;;  %v22_v8 = vld [vmem:[%s1273_s1 + $0x20] sm:$0xff]  ;;  %v23_v9 = vld [vmem:[%s1273_s1 + $0x28] sm:$0xff]  ;;  %vm393_vm2 = vcmask 1047808   ;;  %vm579_vm3 = vcmask 1048064   ;;  %vm765_vm4 = vcmask 1048320  }
   0x8   :  { %889 = vmatprep.subr.mxu0 %v26_v4  ;;  %v24_v10 = vld [vmem:[%s1273_s1 + $0x30] sm:$0xff]  ;;  %v25_v11 = vld [vmem:[%s1273_s1 + $0x38] sm:$0xff]  ;;  %v790_v12 = vld [vmem:[%s1275_s3] ss:$0 sm:$0xff]  ;;  %s1031_s1 = smov 96   ;;  %s1034_s30 = smov [#allocation2]  }
   0x9   :  { %890 = vmatpush3.msra.mxu0 %v26_v4  ;;  %v1115_v37 = vld [vmem:[%s1272_s0] sm:$0xff]  ;;  %v1129_v46 = vld [vmem:[%s1272_s0 + $0x8] sm:$0xff]  ;;  %v1134_v47 = vld [vmem:[%s1272_s0 + $0x10] sm:$0xff]  ;;  %s779_s2 = sshll.u32 %s1034_s30, 4  ;;  %s780_s2 = int_to_ptr.vmem [resolvable:$true] %s779_s2 }
   0xa   :  { %892 = vmatmul.mubr.msk.f32.vlgmr.msra.gmra.mxu0 %vm37_vm0, %v19_v5  ;;  %919 = vmatprep.mubr.msk.f32.mxu1 %vm231_vm1, %v1115_v37  ;;  %v1143_v48 = vld [vmem:[%s1272_s0 + $0x18] sm:$0xff]  ;;  %v1148_v49 = vld [vmem:[%s1272_s0 + $0x20] sm:$0xff]  ;;  %v1157_v50 = vld [vmem:[%s1272_s0 + $0x28] sm:$0xff]  ;;  %s1009_s5 = scalar_lea.vmem %s780_s2, 1024  ;;  %p1014_p1 = scmp.lt.s32.totalorder %s780_s2, %s780_s2 }
   0xb   :  { %894 = vmatprep.mubr.msk.f32.mxu0 %vm37_vm0, %v20_v6  ;;  %v1162_v51 = vld [vmem:[%s1272_s0 + $0x30] sm:$0xff]  ;;  %v1171_v52 = vld [vmem:[%s1272_s0 + $0x38] sm:$0xff]  ;;  %s1033_s0 = smov 64   ;;  %p1010_p0 = scmp.ne.s32.totalorder %s780_s2, %s1009_s5 }
   0xc   :  { %p1015_p2 = scmp.lt.s32.totalorder %s1009_s5, %s1009_s5 }
   0xe   :  { %895 = vmatmul.mubr.msk.f32.gmra.mxu0 %vm37_vm0, %v21_v7  ;;  %p1016_p3 = por %p1015_p2, %p1014_p1 }
   0xf   :  { %897 = vmatprep.mubr.msk.f32.mxu0 %vm37_vm0, %v22_v8 }
  0x10   :  { %p1017_p4 = pnand %p1016_p3, %p1010_p0 }
  0x12   :  { %898 = vmatmul.mubr.msk.f32.gmra.mxu0 %vm37_vm0, %v23_v9 }
  0x13   :  { %900 = vmatprep.mubr.msk.f32.mxu0 %vm37_vm0, %v24_v10 }
  0x16   :  { %901 = vmatmul.mubr.msk.f32.gmra.mxu0 %vm37_vm0, %v25_v11 }
  0x17   :  { %947 = vmatprep.mubr.msk.f32.mxu0 %vm231_vm1, %v1115_v37 }
  0xca   :  { %v893_v13 = vpop.f32.mrf.mxu0 }
  0xcb   :  { %v134_v14 = vadd.f32 %v893_v13, %v790_v12 }
  0xcc   :  { %v128_v15 = vpop.f32.mrf.mxu0 }
  0xcd   :  { %v168_v16 = vmax.f32 %v134_v14, 0.0  ;;  %v129_v17 = vadd.f32 %v790_v12, %v128_v15 }
  0xce   :  { %v896_v18 = vpop.f32.mrf.mxu0 }
  0xcf   :  { %176 = vst [vmem:[#allocation2 + $0x8] sm:$0xff] %v168_v16  ;;  %v167_v19 = vmax.f32 %v129_v17, 0.0  ;;  %v144_v20 = vadd.f32 %v896_v18, %v790_v12 }
  0xd0   :  { %v138_v21 = vpop.f32.mrf.mxu0 }
  0xd1   :  { %175 = vst [vmem:[#allocation2] sm:$0xff] %v167_v19  ;;  %v170_v22 = vmax.f32 %v144_v20, 0.0  ;;  %v139_v23 = vadd.f32 %v790_v12, %v138_v21 }
  0xd2   :  { %v899_v24 = vpop.f32.mrf.mxu0 }
  0xd3   :  { %178 = vst [vmem:[#allocation2 + $0x18] sm:$0xff] %v170_v22  ;;  %v169_v25 = vmax.f32 %v139_v23, 0.0  ;;  %v154_v26 = vadd.f32 %v899_v24, %v790_v12 }
  0xd4   :  { %v148_v27 = vpop.f32.mrf.mxu0 }
  0xd5   :  { %177 = vst [vmem:[#allocation2 + $0x10] sm:$0xff] %v169_v25  ;;  %v172_v28 = vmax.f32 %v154_v26, 0.0  ;;  %v149_v29 = vadd.f32 %v790_v12, %v148_v27 }
  0xd6   :  { %v902_v30 = vpop.f32.mrf.mxu0 }
  0xd7   :  { %180 = vst [vmem:[#allocation2 + $0x28] sm:$0xff] %v172_v28  ;;  %v171_v31 = vmax.f32 %v149_v29, 0.0  ;;  %v164_v32 = vadd.f32 %v902_v30, %v790_v12  ;;  %217 = vrot.lane.b32.xlu1 %v172_v28, %s1031_s1 }
  0xd8   :  { %v158_v33 = vpop.f32.mrf.mxu0 }
  0xd9   :  { %179 = vst [vmem:[#allocation2 + $0x20] sm:$0xff] %v171_v31  ;;  %v174_v34 = vmax.f32 %v164_v32, 0.0  ;;  %v159_v35 = vadd.f32 %v790_v12, %v158_v33 }
  0xdb   :  { %182 = vst [vmem:[#allocation2 + $0x38] sm:$0xff] %v174_v34  ;;  %v173_v36 = vmax.f32 %v159_v35, 0.0  ;;  %221 = vrot.lane.b32.xlu0 %v174_v34, %s1031_s1  ;;  %215 = vrot.lane.b32.xlu1 %v171_v31, %s1031_s1 }
  0xdd   :  { %181 = vst [vmem:[#allocation2 + $0x30] sm:$0xff] %v173_v36 }
  0xdf   :  { %219 = vrot.lane.b32.xlu0 %v173_v36, %s1031_s1  ;;  %211 = vrot.lane.b32.xlu1 %v169_v25, %s1031_s1 }
  0xe3   :  { %213 = vrot.lane.b32.xlu0 %v170_v22, %s1031_s1  ;;  %207 = vrot.lane.b32.xlu1 %v167_v19, %s1031_s1 }
  0xe7   :  { %209 = vrot.lane.b32.xlu0 %v168_v16, %s1031_s1 }
 0x149   :  { %v218_v38 = vpop.permute.xlu1 %217 }
 0x14d   :  { %v222_v39 = vpop.permute.xlu0 %221  ;;  %v216_v40 = vpop.permute.xlu1 %215 }
 0x14e   :  { %903 = vmatprep.subr.mxu1 %v222_v39 }
 0x14f   :  { %904 = vmatpush3.msra.mxu1 %v222_v39 }
 0x151   :  { %v220_v41 = vpop.permute.xlu0 %219  ;;  %v212_v43 = vpop.permute.xlu1 %211 }
 0x152   :  { %905 = vmatprep.subr.mxu1 %v220_v41 }
 0x153   :  { %906 = vmatpush3.msra.mxu1 %v220_v41 }
 0x154   :  { %907 = vmatprep.subr.mxu1 %v218_v38 }
 0x155   :  { %908 = vmatpush3.msra.mxu1 %v218_v38  ;;  %v214_v42 = vpop.permute.xlu0 %213  ;;  %v208_v45 = vpop.permute.xlu1 %207 }
 0x156   :  { %909 = vmatprep.subr.mxu1 %v216_v40 }
 0x157   :  { %910 = vmatpush3.msra.mxu1 %v216_v40 }
 0x158   :  { %911 = vmatprep.subr.mxu1 %v214_v42 }
 0x159   :  { %912 = vmatpush3.msra.mxu1 %v214_v42  ;;  %v210_v44 = vpop.permute.xlu0 %209 }
 0x15a   :  { %913 = vmatprep.subr.mxu1 %v212_v43 }
 0x15b   :  { %914 = vmatpush3.msra.mxu1 %v212_v43 }
 0x15c   :  { %915 = vmatprep.subr.mxu1 %v210_v44 }
 0x15d   :  { %916 = vmatpush3.msra.mxu1 %v210_v44 }
 0x15e   :  { %917 = vmatprep.subr.mxu1 %v208_v45 }
 0x15f   :  { %918 = vmatpush3.msra.mxu1 %v208_v45 }
 0x160   :  { %920 = vmatmul.mubr.msk.f32.vlgmr.msra.gmra.mxu1 %vm231_vm1, %v1129_v46 }
 0x161   :  { %922 = vmatprep.mubr.msk.f32.mxu1 %vm231_vm1, %v1134_v47 }
 0x164   :  { %923 = vmatmul.mubr.msk.f32.gmra.mxu1 %vm231_vm1, %v1143_v48 }
 0x165   :  { %925 = vmatprep.mubr.msk.f32.mxu1 %vm231_vm1, %v1148_v49 }
 0x168   :  { %926 = vmatmul.mubr.msk.f32.gmra.mxu1 %vm231_vm1, %v1157_v50 }
 0x169   :  { %928 = vmatprep.mubr.msk.f32.mxu1 %vm231_vm1, %v1162_v51 }
 0x16c   :  { %929 = vmatmul.mubr.msk.f32.gmra.mxu1 %vm231_vm1, %v1171_v52 }
 0x16d   :  { %978 = vmatprep.mubr.msk.f32.mxu1 %vm231_vm1, %v1134_v47 }
 0x220   :  { %v921_v53 = vpop.f32.mrf.mxu1 }
 0x222   :  { %v322_v54 = vpop.f32.mrf.mxu1 }
 0x224   :  { %v924_v55 = vpop.f32.mrf.mxu1 }
 0x226   :  { %v332_v56 = vpop.f32.mrf.mxu1 }
 0x228   :  { %v927_v57 = vpop.f32.mrf.mxu1 }
 0x22a   :  { %v342_v58 = vpop.f32.mrf.mxu1 }
 0x22c   :  { %v930_v59 = vpop.f32.mrf.mxu1 }
 0x22d   :  { %383 = vrot.lane.b32.xlu0 %v930_v59, %s1032_s29 }
 0x22e   :  { %v352_v60 = vpop.f32.mrf.mxu1 }
 0x22f   :  { %381 = vrot.lane.b32.xlu1 %v352_v60, %s1032_s29 }
 0x231   :  { %379 = vrot.lane.b32.xlu0 %v927_v57, %s1032_s29 }
 0x233   :  { %377 = vrot.lane.b32.xlu1 %v342_v58, %s1032_s29 }
 0x235   :  { %375 = vrot.lane.b32.xlu0 %v924_v55, %s1032_s29 }
 0x237   :  { %373 = vrot.lane.b32.xlu1 %v332_v56, %s1032_s29 }
 0x239   :  { %371 = vrot.lane.b32.xlu0 %v921_v53, %s1032_s29 }
 0x23b   :  { %369 = vrot.lane.b32.xlu1 %v322_v54, %s1032_s29 }
 0x29f   :  { %v384_v61 = vpop.permute.xlu0 %383 }
 0x2a0   :  { %401 = vst.msk [vmem:[#allocation2 + $0x38] sm:$0xff] %vm393_vm2, %v384_v61 }
 0x2a1   :  { %v382_v62 = vpop.permute.xlu1 %381 }
 0x2a2   :  { %400 = vst.msk [vmem:[#allocation2 + $0x30] sm:$0xff] %vm393_vm2, %v382_v62 }
 0x2a3   :  { %v380_v63 = vpop.permute.xlu0 %379 }
 0x2a4   :  { %399 = vst.msk [vmem:[#allocation2 + $0x28] sm:$0xff] %vm393_vm2, %v380_v63 }
 0x2a5   :  { %v378_v0 = vpop.permute.xlu1 %377 }
 0x2a6   :  { %398 = vst.msk [vmem:[#allocation2 + $0x20] sm:$0xff] %vm393_vm2, %v378_v0 }
 0x2a7   :  { %v376_v1 = vpop.permute.xlu0 %375  ;;  %v409_v2 = vld [vmem:[#allocation2 + $0x38] sm:$0xff] }
 0x2a8   :  { %397 = vst.msk [vmem:[#allocation2 + $0x18] sm:$0xff] %vm393_vm2, %v376_v1  ;;  %432 = vrot.lane.b32.xlu0 %v409_v2, %s1033_s0 }
 0x2a9   :  { %v374_v3 = vpop.permute.xlu1 %373  ;;  %v408_v4 = vld [vmem:[#allocation2 + $0x30] sm:$0xff] }
 0x2aa   :  { %396 = vst.msk [vmem:[#allocation2 + $0x10] sm:$0xff] %vm393_vm2, %v374_v3  ;;  %430 = vrot.lane.b32.xlu1 %v408_v4, %s1033_s0 }
 0x2ab   :  { %v372_v5 = vpop.permute.xlu0 %371  ;;  %v407_v6 = vld [vmem:[#allocation2 + $0x28] sm:$0xff] }
 0x2ac   :  { %395 = vst.msk [vmem:[#allocation2 + $0x8] sm:$0xff] %vm393_vm2, %v372_v5  ;;  %428 = vrot.lane.b32.xlu0 %v407_v6, %s1033_s0 }
 0x2ad   :  { %v370_v7 = vpop.permute.xlu1 %369  ;;  %v406_v8 = vld [vmem:[#allocation2 + $0x20] sm:$0xff] }
 0x2ae   :  { %394 = vst.msk [vmem:[#allocation2] sm:$0xff] %vm393_vm2, %v370_v7  ;;  %426 = vrot.lane.b32.xlu1 %v406_v8, %s1033_s0 }
 0x2af   :  { %v405_v9 = vld [vmem:[#allocation2 + $0x18] sm:$0xff] }
 0x2b0   :  { %424 = vrot.lane.b32.xlu0 %v405_v9, %s1033_s0 }
 0x2b1   :  { %v404_v10 = vld [vmem:[#allocation2 + $0x10] sm:$0xff] }
 0x2b2   :  { %422 = vrot.lane.b32.xlu1 %v404_v10, %s1033_s0 }
 0x2b3   :  { %v403_v11 = vld [vmem:[#allocation2 + $0x8] sm:$0xff] }
 0x2b4   :  { %420 = vrot.lane.b32.xlu0 %v403_v11, %s1033_s0 }
 0x2b5   :  { %v402_v12 = vld [vmem:[#allocation2] sm:$0xff] }
 0x2b6   :  { %418 = vrot.lane.b32.xlu1 %v402_v12, %s1033_s0 }
 0x31a   :  { %v433_v13 = vpop.permute.xlu0 %432 }
 0x31b   :  { %931 = vmatprep.subr.mxu0 %v433_v13 }
 0x31c   :  { %932 = vmatpush3.msra.mxu0 %v433_v13  ;;  %v431_v14 = vpop.permute.xlu1 %430 }
 0x31d   :  { %933 = vmatprep.subr.mxu0 %v431_v14 }
 0x31e   :  { %v429_v15 = vpop.permute.xlu0 %428  ;;  %934 = vmatpush3.msra.mxu0 %v431_v14 }
 0x31f   :  { %935 = vmatprep.subr.mxu0 %v429_v15 }
 0x320   :  { %936 = vmatpush3.msra.mxu0 %v429_v15  ;;  %v427_v16 = vpop.permute.xlu1 %426 }
 0x321   :  { %937 = vmatprep.subr.mxu0 %v427_v16 }
 0x322   :  { %v425_v17 = vpop.permute.xlu0 %424  ;;  %938 = vmatpush3.msra.mxu0 %v427_v16 }
 0x323   :  { %939 = vmatprep.subr.mxu0 %v425_v17 }
 0x324   :  { %940 = vmatpush3.msra.mxu0 %v425_v17  ;;  %v423_v18 = vpop.permute.xlu1 %422 }
 0x325   :  { %941 = vmatprep.subr.mxu0 %v423_v18 }
 0x326   :  { %v421_v19 = vpop.permute.xlu0 %420  ;;  %942 = vmatpush3.msra.mxu0 %v423_v18 }
 0x327   :  { %943 = vmatprep.subr.mxu0 %v421_v19 }
 0x328   :  { %944 = vmatpush3.msra.mxu0 %v421_v19  ;;  %v419_v20 = vpop.permute.xlu1 %418 }
 0x329   :  { %945 = vmatprep.subr.mxu0 %v419_v20 }
 0x32a   :  { %946 = vmatpush3.msra.mxu0 %v419_v20 }
 0x32b   :  { %948 = vmatmul.mubr.msk.f32.vlgmr.msra.gmra.mxu0 %vm231_vm1, %v1129_v46 }
 0x32c   :  { %950 = vmatprep.mubr.msk.f32.mxu0 %vm231_vm1, %v1134_v47 }
 0x32f   :  { %951 = vmatmul.mubr.msk.f32.gmra.mxu0 %vm231_vm1, %v1143_v48 }
 0x330   :  { %953 = vmatprep.mubr.msk.f32.mxu0 %vm231_vm1, %v1148_v49 }
 0x333   :  { %954 = vmatmul.mubr.msk.f32.gmra.mxu0 %vm231_vm1, %v1157_v50 }
 0x334   :  { %956 = vmatprep.mubr.msk.f32.mxu0 %vm231_vm1, %v1162_v51 }
 0x337   :  { %957 = vmatmul.mubr.msk.f32.gmra.mxu0 %vm231_vm1, %v1171_v52 }
 0x338   :  { %975 = vmatprep.mubr.msk.f32.mxu0 %vm231_vm1, %v1115_v37 }
 0x3eb   :  { %v949_v21 = vpop.f32.mrf.mxu0 }
 0x3ed   :  { %v508_v22 = vpop.f32.mrf.mxu0 }
 0x3ef   :  { %v952_v23 = vpop.f32.mrf.mxu0 }
 0x3f1   :  { %v518_v24 = vpop.f32.mrf.mxu0 }
 0x3f3   :  { %v955_v25 = vpop.f32.mrf.mxu0 }
 0x3f5   :  { %v528_v26 = vpop.f32.mrf.mxu0 }
 0x3f7   :  { %v958_v27 = vpop.f32.mrf.mxu0 }
 0x3f8   :  { %569 = vrot.lane.b32.xlu0 %v958_v27, %s1033_s0 }
 0x3f9   :  { %v538_v28 = vpop.f32.mrf.mxu0 }
 0x3fa   :  { %567 = vrot.lane.b32.xlu1 %v538_v28, %s1033_s0 }
 0x3fc   :  { %565 = vrot.lane.b32.xlu0 %v955_v25, %s1033_s0 }
 0x3fe   :  { %563 = vrot.lane.b32.xlu1 %v528_v26, %s1033_s0 }
 0x400   :  { %561 = vrot.lane.b32.xlu0 %v952_v23, %s1033_s0 }
 0x402   :  { %559 = vrot.lane.b32.xlu1 %v518_v24, %s1033_s0 }
 0x404   :  { %557 = vrot.lane.b32.xlu0 %v949_v21, %s1033_s0 }
 0x406   :  { %555 = vrot.lane.b32.xlu1 %v508_v22, %s1033_s0 }
 0x46a   :  { %v570_v29 = vpop.permute.xlu0 %569 }
 0x46b   :  { %587 = vst.msk [vmem:[#allocation2 + $0x38] sm:$0xff] %vm579_vm3, %v570_v29 }
 0x46c   :  { %v568_v30 = vpop.permute.xlu1 %567 }
 0x46d   :  { %586 = vst.msk [vmem:[#allocation2 + $0x30] sm:$0xff] %vm579_vm3, %v568_v30 }
 0x46e   :  { %v566_v31 = vpop.permute.xlu0 %565 }
 0x46f   :  { %585 = vst.msk [vmem:[#allocation2 + $0x28] sm:$0xff] %vm579_vm3, %v566_v31 }
 0x470   :  { %v564_v32 = vpop.permute.xlu1 %563 }
 0x471   :  { %584 = vst.msk [vmem:[#allocation2 + $0x20] sm:$0xff] %vm579_vm3, %v564_v32 }
 0x472   :  { %v562_v33 = vpop.permute.xlu0 %561  ;;  %v595_v34 = vld [vmem:[#allocation2 + $0x38] sm:$0xff] }
 0x473   :  { %583 = vst.msk [vmem:[#allocation2 + $0x18] sm:$0xff] %vm579_vm3, %v562_v33  ;;  %618 = vrot.lane.b32.xlu0 %v595_v34, %s1032_s29 }
 0x474   :  { %v560_v35 = vpop.permute.xlu1 %559  ;;  %v594_v36 = vld [vmem:[#allocation2 + $0x30] sm:$0xff] }
 0x475   :  { %582 = vst.msk [vmem:[#allocation2 + $0x10] sm:$0xff] %vm579_vm3, %v560_v35  ;;  %616 = vrot.lane.b32.xlu1 %v594_v36, %s1032_s29 }
 0x476   :  { %v558_v37 = vpop.permute.xlu0 %557  ;;  %v593_v38 = vld [vmem:[#allocation2 + $0x28] sm:$0xff] }
 0x477   :  { %581 = vst.msk [vmem:[#allocation2 + $0x8] sm:$0xff] %vm579_vm3, %v558_v37  ;;  %614 = vrot.lane.b32.xlu0 %v593_v38, %s1032_s29 }
 0x478   :  { %v556_v39 = vpop.permute.xlu1 %555  ;;  %v592_v40 = vld [vmem:[#allocation2 + $0x20] sm:$0xff] }
 0x479   :  { %580 = vst.msk [vmem:[#allocation2] sm:$0xff] %vm579_vm3, %v556_v39  ;;  %612 = vrot.lane.b32.xlu1 %v592_v40, %s1032_s29 }
 0x47a   :  { %v591_v41 = vld [vmem:[#allocation2 + $0x18] sm:$0xff] }
 0x47b   :  { %610 = vrot.lane.b32.xlu0 %v591_v41, %s1032_s29 }
 0x47c   :  { %v590_v42 = vld [vmem:[#allocation2 + $0x10] sm:$0xff] }
 0x47d   :  { %608 = vrot.lane.b32.xlu1 %v590_v42, %s1032_s29 }
 0x47e   :  { %v589_v43 = vld [vmem:[#allocation2 + $0x8] sm:$0xff] }
 0x47f   :  { %606 = vrot.lane.b32.xlu0 %v589_v43, %s1032_s29 }
 0x480   :  { %v588_v44 = vld [vmem:[#allocation2] sm:$0xff] }
 0x481   :  { %604 = vrot.lane.b32.xlu1 %v588_v44, %s1032_s29 }
 0x4e5   :  { %v619_v45 = vpop.permute.xlu0 %618 }
 0x4e6   :  { %959 = vmatprep.subr.mxu0 %v619_v45  ;;  %987 = vmatprep.subr.mxu1 %v619_v45 }
 0x4e7   :  { %960 = vmatpush3.msra.mxu0 %v619_v45  ;;  %995 = vmatpush3.msra.mxu1 %v619_v45  ;;  %v617_v47 = vpop.permute.xlu1 %616 }
 0x4e8   :  { %961 = vmatprep.subr.mxu0 %v617_v47  ;;  %988 = vmatprep.subr.mxu1 %v617_v47 }
 0x4e9   :  { %v615_v53 = vpop.permute.xlu0 %614  ;;  %962 = vmatpush3.msra.mxu0 %v617_v47  ;;  %996 = vmatpush3.msra.mxu1 %v617_v47 }
 0x4ea   :  { %963 = vmatprep.subr.mxu0 %v615_v53  ;;  %989 = vmatprep.subr.mxu1 %v615_v53 }
 0x4eb   :  { %964 = vmatpush3.msra.mxu0 %v615_v53  ;;  %997 = vmatpush3.msra.mxu1 %v615_v53  ;;  %v613_v54 = vpop.permute.xlu1 %612 }
 0x4ec   :  { %965 = vmatprep.subr.mxu0 %v613_v54  ;;  %990 = vmatprep.subr.mxu1 %v613_v54 }
 0x4ed   :  { %v611_v55 = vpop.permute.xlu0 %610  ;;  %966 = vmatpush3.msra.mxu0 %v613_v54  ;;  %998 = vmatpush3.msra.mxu1 %v613_v54 }
 0x4ee   :  { %967 = vmatprep.subr.mxu0 %v611_v55  ;;  %991 = vmatprep.subr.mxu1 %v611_v55 }
 0x4ef   :  { %968 = vmatpush3.msra.mxu0 %v611_v55  ;;  %999 = vmatpush3.msra.mxu1 %v611_v55  ;;  %v609_v56 = vpop.permute.xlu1 %608 }
 0x4f0   :  { %969 = vmatprep.subr.mxu0 %v609_v56  ;;  %992 = vmatprep.subr.mxu1 %v609_v56 }
 0x4f1   :  { %v607_v57 = vpop.permute.xlu0 %606  ;;  %970 = vmatpush3.msra.mxu0 %v609_v56  ;;  %1000 = vmatpush3.msra.mxu1 %v609_v56 }
 0x4f2   :  { %971 = vmatprep.subr.mxu0 %v607_v57  ;;  %993 = vmatprep.subr.mxu1 %v607_v57 }
 0x4f3   :  { %972 = vmatpush3.msra.mxu0 %v607_v57  ;;  %1001 = vmatpush3.msra.mxu1 %v607_v57  ;;  %v605_v58 = vpop.permute.xlu1 %604 }
 0x4f4   :  { %973 = vmatprep.subr.mxu0 %v605_v58  ;;  %994 = vmatprep.subr.mxu1 %v605_v58 }
 0x4f5   :  { %974 = vmatpush3.msra.mxu0 %v605_v58  ;;  %1002 = vmatpush3.msra.mxu1 %v605_v58 }
 0x4f6   :  { %976 = vmatmul.mubr.msk.f32.vlgmr.msra.gmra.mxu0 %vm231_vm1, %v1129_v46  ;;  %979 = vmatmul.mubr.msk.f32.vlgmr.msra.gmra.mxu1 %vm231_vm1, %v1143_v48 }
 0x4f7   :  { %981 = vmatprep.mubr.msk.f32.mxu1 %vm231_vm1, %v1148_v49 }
 0x4fa   :  { %982 = vmatmul.mubr.msk.f32.gmra.mxu1 %vm231_vm1, %v1157_v50 }
 0x4fb   :  { %984 = vmatprep.mubr.msk.f32.mxu1 %vm231_vm1, %v1162_v51 }
 0x4fe   :  { %985 = vmatmul.mubr.msk.f32.gmra.mxu1 %vm231_vm1, %v1171_v52 }
 0x5b6   :  { %v977_v59 = vpop.f32.mrf.mxu0  ;;  %v980_v60 = vpop.f32.mrf.mxu1 }
 0x5b7   :  { %743 = vrot.lane.b32.xlu1 %v977_v59, %s1031_s1 }
 0x5b8   :  { %v694_v46 = vpop.f32.mrf.mxu0  ;;  %v704_v61 = vpop.f32.mrf.mxu1 }
 0x5b9   :  { %741 = vrot.lane.b32.xlu0 %v694_v46, %s1031_s1 }
 0x5ba   :  { %v983_v48 = vpop.f32.mrf.mxu1 }
 0x5bb   :  { %747 = vrot.lane.b32.xlu1 %v980_v60, %s1031_s1 }
 0x5bc   :  { %v714_v49 = vpop.f32.mrf.mxu1 }
 0x5bd   :  { %745 = vrot.lane.b32.xlu0 %v704_v61, %s1031_s1 }
 0x5be   :  { %v986_v50 = vpop.f32.mrf.mxu1 }
 0x5bf   :  { %751 = vrot.lane.b32.xlu1 %v983_v48, %s1031_s1 }
 0x5c0   :  { %v724_v51 = vpop.f32.mrf.mxu1 }
 0x5c1   :  { %749 = vrot.lane.b32.xlu0 %v714_v49, %s1031_s1 }
 0x5c3   :  { %755 = vrot.lane.b32.xlu1 %v986_v50, %s1031_s1 }
 0x5c5   :  { %753 = vrot.lane.b32.xlu0 %v724_v51, %s1031_s1 }
 0x629   :  { %v744_v52 = vpop.permute.xlu1 %743 }
 0x62a   :  { %767 = vst.msk [vmem:[#allocation2 + $0x8] sm:$0xff] %vm765_vm4, %v744_v52 }
 0x62b   :  { %v742_v62 = vpop.permute.xlu0 %741 }
 0x62c   :  { %766 = vst.msk [vmem:[#allocation2] sm:$0xff] %vm765_vm4, %v742_v62 }
 0x62d   :  { %v748_v63 = vpop.permute.xlu1 %747 }
 0x62e   :  { %769 = vst.msk [vmem:[#allocation2 + $0x18] sm:$0xff] %vm765_vm4, %v748_v63 }
 0x62f   :  { %v746_v0 = vpop.permute.xlu0 %745 }
 0x630   :  { %768 = vst.msk [vmem:[#allocation2 + $0x10] sm:$0xff] %vm765_vm4, %v746_v0 }
 0x631   :  { %v752_v1 = vpop.permute.xlu1 %751 }
 0x632   :  { %771 = vst.msk [vmem:[#allocation2 + $0x28] sm:$0xff] %vm765_vm4, %v752_v1 }
 0x633   :  { %v750_v2 = vpop.permute.xlu0 %749 }
 0x634   :  { %770 = vst.msk [vmem:[#allocation2 + $0x20] sm:$0xff] %vm765_vm4, %v750_v2 }
 0x635   :  { %v756_v3 = vpop.permute.xlu1 %755 }
 0x636   :  { %773 = vst.msk [vmem:[#allocation2 + $0x38] sm:$0xff] %vm765_vm4, %v756_v3 }
 0x637   :  { %v754_v4 = vpop.permute.xlu0 %753 }
 0x638   :  { %772 = vst.msk [vmem:[#allocation2 + $0x30] sm:$0xff] %vm765_vm4, %v754_v4 }
 0x639   :  { %1020 = shalt.err (!%p1017_p4)
}
 0x63a   :  { %s1035_s6 = smov 128   ;;  %s1036_s7 = smov 8  }
 0x63b   :  { %785 = dma.vmem_to_hbm [thread:$0]  %s780_s2, 1024, %s1276_s4, [#allocation3], %s1035_s6, %s1035_s6, %s1036_s7  }
 0x63c   :  { %1029 = dma.done.wait [#allocation3], 1024  }
 0x63d   :  { %1030 = vsyncadd [#allocation3], 4294966272 }
 0x63e   :  { %789 = vsyncpa [#allocation3], 1 }

</bundles_post_ra>
